<compile_context>
chip_gen: v7x
topology: tpu7x:2x2x1
jax: 0.10.0
libtpu: 0.0.40
codegen_flags: <defaults>
</compile_context>

<pallas_src>
import functools

import jax
import jax.numpy as jnp
from jax.experimental import pallas as pl
from jax.experimental.pallas import tpu as pltpu

LANE = 128
MAX_BLOCK_BYTES = 2 * 1024 * 1024   # per-input VMEM block (widest dtype)
NSPLIT = 2                          # leading "parallel" grid axis


def _round_up(x, m):
    return ((x + m - 1) // m) * m


def _sublane_multiple(dtype):
    # f32 -> 8, bf16/f16 -> 16, int8/fp8 -> 32 (sub-32-bit packs along sublanes)
    return 8 * (4 // jnp.dtype(dtype).itemsize)


def _int_pow(x, n):
    """x**n for a small positive integer n using only VPU multiplies."""
    acc = None
    base = x
    while n:
        if n & 1:
            acc = base if acc is None else acc * base
        n >>= 1
        if n:
            base = base * base
    return acc


def _uses_exp_path(gamma):
    return not (gamma == 0.0 or (gamma == int(gamma) and 0 < int(gamma) <= 8))


def _focal_pows(p, logp, log1mp, gamma):
    """((1-p)**gamma, p**gamma) without float pow; EUP only if unavoidable."""
    if gamma == 0.0:
        return jnp.ones_like(p), jnp.ones_like(p)
    if not _uses_exp_path(gamma):
        g = int(gamma)
        return _int_pow(1.0 - p, g), _int_pow(p, g)
    # Non-integer gamma: reuse the logs we already computed (2 extra EUP ops).
    return jnp.exp(gamma * log1mp), jnp.exp(gamma * logp)


def _focal_loss_kernel(p_ref, t_ref, o_ref, *, gamma, full_rows, rem,
                       block_rows, tiles_per_split, needs_mask,
                       reduce_by_sublane):
    s = pl.program_id(0)          # parallel split axis
    i = pl.program_id(1)          # reduction axis (innermost)

    # The output block is the accumulator (resident across axis i).
    @pl.when(i == 0)
    def _():
        o_ref[...] = jnp.zeros_like(o_ref)

    p = p_ref[...].astype(jnp.float32)
    t = t_ref[...].astype(jnp.float32)

    logp = jnp.log(p)
    log1mp = jnp.log1p(-p)        # better numerics than log(1 - p) near p -> 1
    pow_1mp, pow_p = _focal_pows(p, logp, log1mp, gamma)

    # Unsigned / unscaled integrand: final loss = -alpha * sum(val) (wrapper).
    val = pow_1mp * t * logp + pow_p * (1.0 - t) * log1mp

    def accumulate(x):
        if reduce_by_sublane:
            # Pure-VPU partial reduce to one (8, LANE) vreg; the cross-lane /
            # cross-sublane XLU reduce happens only once, in the wrapper.
            o_ref[...] += x.reshape(block_rows // 8, 8, LANE).sum(axis=0)
        else:
            # Only reachable on a 1-step grid (full-dim row block).
            o_ref[0, 0] = jnp.sum(x)

    if not needs_mask:
        accumulate(val)
        return

    # Only boundary tiles (containing padded or out-of-range rows) pay for
    # the masking; interior tiles accumulate unmasked.
    row_start = (s * tiles_per_split + i) * block_rows
    is_boundary = row_start + block_rows > full_rows

    @pl.when(jnp.logical_not(is_boundary))
    def _():
        accumulate(val)

    @pl.when(is_boundary)
    def _():
        row_ids = row_start + jax.lax.broadcasted_iota(jnp.int32, val.shape, 0)
        valid = row_ids < full_rows
        if rem:
            lane_ids = jax.lax.broadcasted_iota(jnp.int32, val.shape, 1)
            valid = valid | ((row_ids == full_rows) & (lane_ids < rem))
        accumulate(jnp.where(valid, val, 0.0))   # select: discards NaN garbage


def focal_loss(p, t, gamma=2, alpha=0.25, reduction="elementwise_mean",
               max_block_bytes=MAX_BLOCK_BYTES):
    """Pallas focal loss. p, t: same shape, any rank/size. Returns scalar f32."""
    assert p.shape == t.shape
    n_elems = p.size
    gamma = float(gamma)
    # Matches PyTorch `if self.alpha:` (alpha in {None, 0} -> no scaling).
    scale = float(alpha) if alpha else 1.0

    sublane = max(_sublane_multiple(p.dtype), _sublane_multiple(t.dtype))
    max_itemsize = max(jnp.dtype(p.dtype).itemsize, jnp.dtype(t.dtype).itemsize)
    max_block_rows = max(
        sublane, (max_block_bytes // (LANE * max_itemsize)) // sublane * sublane)

    rows = pl.cdiv(n_elems, LANE)
    full_rows, rem = divmod(n_elems, LANE)

    if rows <= max_block_rows:
        # Whole problem is one tile: a full-dim row block is always legal.
        nsplit, tiles_per_split, block_rows = 1, 1, rows
    else:
        nsplit = NSPLIT if rows >= NSPLIT * max_block_rows else 1
        tiles_per_split = pl.cdiv(rows, nsplit * max_block_rows)
        block_rows = min(
            _round_up(pl.cdiv(rows, nsplit * tiles_per_split), sublane),
            max_block_rows)

    grid_blocks = nsplit * tiles_per_split
    needs_mask = grid_blocks * block_rows * LANE > n_elems
    reduce_by_sublane = (block_rows % 8 == 0)

    # Lane-dense [rows, 128] view. Pure reshape (no HBM copy) when
    # n_elems % 128 == 0; otherwise pad only up to the next 128-element row.
    def to_slab(x):
        flat = x.reshape(-1)
        n_pad = rows * LANE - n_elems
        if n_pad:
            flat = jnp.pad(flat, (0, n_pad),
                           constant_values=jnp.asarray(0.5, flat.dtype))
        return flat.reshape(rows, LANE)

    p2, t2 = to_slab(p), to_slab(t)

    # Input index map; clamp so no tile starts past the last row block (such
    # tiles re-read the last block and are fully masked in-kernel).
    num_row_blocks = pl.cdiv(rows, block_rows)
    if grid_blocks > num_row_blocks:
        def in_map(s, i):
            return (jnp.minimum(s * tiles_per_split + i, num_row_blocks - 1), 0)
    else:
        def in_map(s, i):
            return (s * tiles_per_split + i, 0)

    kernel = functools.partial(
        _focal_loss_kernel, gamma=gamma, full_rows=full_rows, rem=rem,
        block_rows=block_rows, tiles_per_split=tiles_per_split,
        needs_mask=needs_mask, reduce_by_sublane=reduce_by_sublane)

    n_transc = (4 if _uses_exp_path(gamma) else 2) * n_elems
    cost = pl.CostEstimate(
        flops=12 * n_elems, transcendentals=n_transc,
        bytes_accessed=n_elems * (jnp.dtype(p.dtype).itemsize +
                                  jnp.dtype(t.dtype).itemsize)
                       + nsplit * 8 * LANE * 4)

    partials = pl.pallas_call(
        kernel,
        out_shape=jax.ShapeDtypeStruct((nsplit * 8, LANE), jnp.float32),
        grid_spec=pltpu.PrefetchScalarGridSpec(
            num_scalar_prefetch=0,
            grid=(nsplit, tiles_per_split),
            in_specs=[pl.BlockSpec((block_rows, LANE), in_map),
                      pl.BlockSpec((block_rows, LANE), in_map)],
            out_specs=pl.BlockSpec((8, LANE), lambda s, i: (s, 0)),
        ),
        compiler_params=pltpu.CompilerParams(
            dimension_semantics=("parallel", "arbitrary"),
            vmem_limit_bytes=32 * 1024 * 1024),
        cost_estimate=cost,
    )(p2, t2)

    total = jnp.sum(partials)         # tiny (nsplit*8, 128) reduce in XLA
    loss_sum = -scale * total         # fold negation + alpha in once
    if reduction == "elementwise_mean":
        return loss_sum / jnp.float32(n_elems)
    elif reduction == "sum":
        return loss_sum
    else:
        # TODO(synk): reduction='none' (elementwise output) not implemented.
        raise NotImplementedError(reduction)


def focal_loss_ref(p, t, gamma=2.0, alpha=0.25):
    p = p.astype(jnp.float32)
    t = t.astype(jnp.float32)
    loss = (-(1.0 - p) ** gamma * t * jnp.log(p)
            - p ** gamma * (1.0 - t) * jnp.log(1.0 - p))
    if alpha:
        loss = loss * alpha
    return jnp.mean(loss)


if __name__ == "__main__":
    key = jax.random.PRNGKey(0)
    k1, k2, k3, k4, k5, k6 = jax.random.split(key, 6)

    # 1) NCHW-like probabilities: batch=2, channels=4, spatial=16x16 (2048 el).
    shape = (2, 4, 16, 16)
    p = jax.random.uniform(k1, shape, jnp.float32, 0.05, 0.95)
    t = jax.random.uniform(k2, shape, jnp.float32)
    out = jax.block_until_ready(focal_loss(p, t))
    ref = focal_loss_ref(p, t)
    assert jnp.allclose(out, ref, rtol=1e-5, atol=1e-6), (out, ref)

    # 2) Ragged size (1155 elements): host 128-pad + in-kernel tail mask.
    shape2 = (3, 5, 7, 11)
    p2 = jax.random.uniform(k3, shape2, jnp.float32, 0.05, 0.95)
    t2 = jax.random.uniform(k4, shape2, jnp.float32)
    out2 = jax.block_until_ready(focal_loss(p2, t2))
    ref2 = focal_loss_ref(p2, t2)
    assert jnp.allclose(out2, ref2, rtol=1e-5, atol=1e-6), (out2, ref2)

    # 3) bf16 inputs (half the HBM traffic; math is f32 in-kernel).
    out3 = jax.block_until_ready(
        focal_loss(p.astype(jnp.bfloat16), t.astype(jnp.bfloat16)))
    ref3 = focal_loss_ref(p.astype(jnp.bfloat16), t.astype(jnp.bfloat16))
    assert jnp.allclose(out3, ref3, rtol=1e-4, atol=1e-5), (out3, ref3)

    # 4) Small max_block_bytes forces the multi-tile + 2-way-split + boundary
    #    masking + clamped-index paths at a small size (5040 elements),
    #    plus an integer-gamma != 2 fast path.
    shape4 = (8, 9, 70)
    p4 = jax.random.uniform(k5, shape4, jnp.float32, 0.05, 0.95)
    t4 = jax.random.uniform(k6, shape4, jnp.float32)
    out4 = jax.block_until_ready(
        focal_loss(p4, t4, gamma=3, alpha=0.5, max_block_bytes=8 * 1024))
    ref4 = focal_loss_ref(p4, t4, gamma=3.0, alpha=0.5)
    assert jnp.allclose(out4, ref4, rtol=1e-5, atol=1e-6), (out4, ref4)

    print("KERNEL_OK")
</pallas_src>

<mosaic_0001>
module attributes {stable_mosaic.version = 11 : i64} {
  func.func @_focal_loss_kernel(%arg0: i32, %arg1: i32, %arg2: memref<16x128xf32, #tpu.memory_space<vmem>>, %arg3: memref<16x128xf32, #tpu.memory_space<vmem>>, %arg4: memref<8x128xf32, #tpu.memory_space<vmem>>) attributes {dimension_semantics = [#tpu.dimension_semantics<parallel>, #tpu.dimension_semantics<arbitrary>], iteration_bounds = array<i64: 1, 1>, scalar_prefetch = 0 : i64, scratch_operands = 0 : i64, tpu.core_type = #tpu.core_type<tc>, window_params = [{transform_indices = @transform_0, window_bounds = array<i64: 16, 128>}, {transform_indices = @transform_1, window_bounds = array<i64: 16, 128>}, {transform_indices = @transform_2, window_bounds = array<i64: 8, 128>}]} {
    %c0_i32 = arith.constant 0 : i32
    %0 = arith.cmpi eq, %arg1, %c0_i32 : i32
    %1 = arith.extui %0 : i1 to i32
    %c0_i32_0 = arith.constant 0 : i32
    %2 = arith.cmpi ne, %1, %c0_i32_0 : i32
    scf.if %2 {
      %cst_11 = arith.constant 0.000000e+00 : f32
      %25 = vector.broadcast %cst_11 : f32 to vector<8x128xf32>
      %c0_12 = arith.constant 0 : index
      %c0_13 = arith.constant 0 : index
      %26 = vector.load %arg4[%c0_12, %c0_13] : memref<8x128xf32, #tpu.memory_space<vmem>>, vector<8x128xf32>
      tpu.vector_store %arg4[%c0_12, %c0_13], %25 {strides = array<i32>} : memref<8x128xf32, #tpu.memory_space<vmem>>, vector<8x128xf32>,
    } else {
    }
    %c0 = arith.constant 0 : index
    %c0_1 = arith.constant 0 : index
    %3 = vector.load %arg2[%c0, %c0_1] : memref<16x128xf32, #tpu.memory_space<vmem>>, vector<16x128xf32>
    %c0_2 = arith.constant 0 : index
    %c0_3 = arith.constant 0 : index
    %4 = vector.load %arg3[%c0_2, %c0_3] : memref<16x128xf32, #tpu.memory_space<vmem>>, vector<16x128xf32>
    %5 = math.log %3 : vector<16x128xf32>
    %cst = arith.constant 0.000000e+00 : f32
    %6 = vector.broadcast %cst : f32 to vector<16x128xf32>
    %7 = arith.subf %6, %3 : vector<16x128xf32>
    %8 = math.log1p %7 : vector<16x128xf32>
    %cst_4 = arith.constant 1.000000e+00 : f32
    %9 = vector.broadcast %cst_4 : f32 to vector<16x128xf32>
    %10 = arith.subf %9, %3 : vector<16x128xf32>
    %11 = arith.mulf %10, %10 : vector<16x128xf32>
    %12 = arith.mulf %3, %3 : vector<16x128xf32>
    %13 = arith.mulf %11, %4 : vector<16x128xf32>
    %14 = arith.mulf %13, %5 : vector<16x128xf32>
    %cst_5 = arith.constant 1.000000e+00 : f32
    %15 = vector.broadcast %cst_5 : f32 to vector<16x128xf32>
    %16 = arith.subf %15, %4 : vector<16x128xf32>
    %17 = arith.mulf %12, %16 : vector<16x128xf32>
    %18 = arith.mulf %17, %8 : vector<16x128xf32>
    %19 = arith.addf %14, %18 : vector<16x128xf32>
    %c0_6 = arith.constant 0 : index
    %c0_7 = arith.constant 0 : index
    %20 = vector.load %arg4[%c0_6, %c0_7] : memref<8x128xf32, #tpu.memory_space<vmem>>, vector<8x128xf32>
    %21 = vector.shape_cast %19 : vector<16x128xf32> to vector<2x8x128xf32>
    %cst_8 = arith.constant dense<0.000000e+00> : vector<8x128xf32>
    %22 = vector.multi_reduction <add>, %21, %cst_8 [0] : vector<2x8x128xf32> to vector<8x128xf32>
    %23 = arith.addf %20, %22 : vector<8x128xf32>
    %c0_9 = arith.constant 0 : index
    %c0_10 = arith.constant 0 : index
    %24 = vector.load %arg4[%c0_9, %c0_10] : memref<8x128xf32, #tpu.memory_space<vmem>>, vector<8x128xf32>
    tpu.vector_store %arg4[%c0_9, %c0_10], %23 {strides = array<i32>} : memref<8x128xf32, #tpu.memory_space<vmem>>, vector<8x128xf32>,
    return
  }
  func.func @transform_0(%arg0: i32, %arg1: i32) -> (i32, i32) {
    %c1_i32 = arith.constant 1 : i32
    %0 = arith.muli %arg0, %c1_i32 : i32
    %1 = arith.addi %0, %arg1 : i32
    %c0_i32 = arith.constant 0 : i32
    %c0_i32_0 = arith.constant 0 : i32
    return %1, %c0_i32 : i32, i32
  }
  func.func @transform_1(%arg0: i32, %arg1: i32) -> (i32, i32) {
    %c1_i32 = arith.constant 1 : i32
    %0 = arith.muli %arg0, %c1_i32 : i32
    %1 = arith.addi %0, %arg1 : i32
    %c0_i32 = arith.constant 0 : i32
    %c0_i32_0 = arith.constant 0 : i32
    return %1, %c0_i32 : i32, i32
  }
  func.func @transform_2(%arg0: i32, %arg1: i32) -> (i32, i32) {
    %c0_i32 = arith.constant 0 : i32
    %c0_i32_0 = arith.constant 0 : i32
    return %arg0, %c0_i32 : i32, i32
  }
}

</mosaic_0001>

<bundles_post_ra>
// kernel: tpu_custom_call.1
= control target key start
LH: loop header
LB: loop body
LE: loop exit
PB: predicated region body
PF: predicated region fallthrough
CT: control target
= control target key end

     0   :  { %7 = vsyncpa [#allocation3], 0  ;;  %s265_s0 = inlined_call_operand.hbm [shape: f32[16,128], index: 0, kind: input, shape index: {}]   ;;  %s266_s1 = inlined_call_operand.hbm [shape: f32[16,128], index: 1, kind: input, shape index: {}]   ;;  %s267_s2 = inlined_call_operand.hbm [shape: f32[8,128], index: 2, kind: output, shape index: {}]  }
   0x1   :  { %8 = vsyncpa [#allocation6], 0 }
   0x2   :  { %9 = vsyncpa [#allocation4], 0  ;;  %s209_s9 = smov [#allocation2]   ;;  %s137_s13 = scalar_lea.hbm %s265_s0, 256 }
   0x3   :  { %s19_s10 = sshll.u32 %s209_s9, 4  ;;  %p138_p0 = scmp.ne.s32.totalorder %s265_s0, %s137_s13  ;;  %s20_s10 = int_to_ptr.vmem [resolvable:$true] %s19_s10 }
   0x4   :  { %p141_p1 = scmp.lt.u32.totalorder %s137_s13, %s265_s0 }
   0x6   :  { %p143_p2 = pnand %p141_p1, %p138_p0 }
   0x8   :  { %146 = shalt.err (!%p143_p2)
}
   0x9   :  { %s147_s18 = scalar_lea.vmem %s20_s10, 256  ;;  %p152_p4 = scmp.lt.s32.totalorder %s20_s10, %s20_s10 }
   0xa   :  { %p148_p3 = scmp.ne.s32.totalorder %s20_s10, %s147_s18  ;;  %p153_p5 = scmp.lt.s32.totalorder %s147_s18, %s147_s18 }
   0xc   :  { %p154_p6 = por %p153_p5, %p152_p4 }
   0xe   :  { %p155_p7 = pnand %p154_p6, %p148_p3 }
  0x10   :  { %158 = shalt.err (!%p155_p7)
}
  0x11   :  { %s210_s19 = smov 128   ;;  %s211_s20 = smov 8  }
  0x12   :  { %25 = dma.hbm_to_vmem [thread:$0]  %s265_s0, 256, %s20_s10, [#allocation3], %s210_s19, %s210_s19, %s211_s20  }
  0x13   :  { %s212_s23 = smov [#allocation5]   ;;  %s159_s27 = scalar_lea.hbm %s266_s1, 256 }
  0x14   :  { %s35_s24 = sshll.u32 %s212_s23, 4  ;;  %p160_p8 = scmp.ne.s32.totalorder %s266_s1, %s159_s27  ;;  %s36_s24 = int_to_ptr.vmem [resolvable:$true] %s35_s24 }
  0x15   :  { %p163_p9 = scmp.lt.u32.totalorder %s159_s27, %s266_s1 }
  0x17   :  { %p165_p10 = pnand %p163_p9, %p160_p8 }
  0x19   :  { %168 = shalt.err (!%p165_p10)
}
  0x1a   :  { %s169_s4 = scalar_lea.vmem %s36_s24, 256  ;;  %p174_p12 = scmp.lt.s32.totalorder %s36_s24, %s36_s24 }
  0x1b   :  { %p170_p11 = scmp.ne.s32.totalorder %s36_s24, %s169_s4  ;;  %p175_p13 = scmp.lt.s32.totalorder %s169_s4, %s169_s4 }
  0x1d   :  { %p176_p0 = por %p175_p13, %p174_p12 }
  0x1f   :  { %p177_p1 = pnand %p176_p0, %p170_p11 }
  0x21   :  { %180 = shalt.err (!%p177_p1)
}
  0x22   :  { %41 = dma.hbm_to_vmem [thread:$0]  %s266_s1, 256, %s36_s24, [#allocation6], %s210_s19, %s210_s19, %s211_s20  }
  0x23   :  { %203 = dma.done.wait [#allocation3], 256  }
  0x24   :  { %204 = vsyncadd [#allocation3], 4294967040 }
  0x25   :  { %205 = dma.done.wait [#allocation6], 256  }
  0x26   :  { %206 = vsyncadd [#allocation6], 4294967040  ;;  %v57_v0 = vld [vmem:[#allocation2] sm:$0xff]  ;;  %v58_v1 = vld [vmem:[#allocation2 + $0x8] sm:$0xff]  ;;  %s213_s1 = smov [#allocation7]  }
  0x27   :  { %129 = vlog2.f32 %v57_v0  ;;  %v65_v2 = vsub.f32 0.0, %v57_v0  ;;  %v66_v3 = vsub.f32 0.0, %v58_v1  ;;  %v85_v6 = vsub.f32 1.0, %v57_v0  ;;  %v59_v10 = vld [vmem:[#allocation5] sm:$0xff]  ;;  %v60_v11 = vld [vmem:[#allocation5 + $0x8] sm:$0xff]  ;;  %s113_s6 = sshll.u32 %s213_s1, 4  ;;  %s114_s6 = int_to_ptr.vmem [resolvable:$true] %s113_s6 }
  0x28   :  { %131 = vlog2.f32 %v58_v1  ;;  %v86_v8 = vsub.f32 1.0, %v58_v1  ;;  %v89_v18 = vmul.f32 %v57_v0, %v57_v0  ;;  %v95_v19 = vsub.f32 1.0, %v59_v10  ;;  %s181_s7 = scalar_lea.vmem %s114_s6, 128  ;;  %p186_p3 = scmp.lt.s32.totalorder %s114_s6, %s114_s6 }
  0x29   :  { %v67_v4 = vadd.f32 1.0, %v65_v2  ;;  %v76_v5 = vadd.f32 1.0, %v66_v3  ;;  %v70_v7 = vmul.f32 -0.5, %v65_v2  ;;  %v79_v9 = vmul.f32 -0.5, %v66_v3  ;;  %p182_p2 = scmp.ne.s32.totalorder %s114_s6, %s181_s7  ;;  %p187_p4 = scmp.lt.s32.totalorder %s181_s7, %s181_s7 }
  0x2a   :  { %v87_v12 = vmul.f32 %v85_v6, %v85_v6  ;;  %v88_v14 = vmul.f32 %v86_v8, %v86_v8  ;;  %v73_v16 = vand.u32 2147483647, %v65_v2  ;;  %v82_v21 = vand.u32 2147483647, %v66_v3 }
  0x2b   :  { %133 = vlog2.f32 %v67_v4  ;;  %v71_v13 = vadd.f32 1.0, %v70_v7  ;;  %v80_v17 = vadd.f32 1.0, %v79_v9  ;;  %v90_v22 = vmul.f32 %v58_v1, %v58_v1  ;;  %p188_p5 = por %p187_p4, %p186_p3 }
  0x2c   :  { %135 = vlog2.f32 %v76_v5  ;;  %v96_v23 = vsub.f32 1.0, %v60_v11  ;;  %v91_v25 = vmul.f32 %v87_v12, %v59_v10  ;;  %v92_v28 = vmul.f32 %v88_v14, %v60_v11 }
  0x2d   :  { %v72_v27 = vmul.f32 %v71_v13, %v65_v2  ;;  %vm74_vm0 = vcmp.lt.f32.partialorder %v73_v16, 0.0004427343  ;;  %v81_v30 = vmul.f32 %v80_v17, %v66_v3  ;;  %v97_v31 = vmul.f32 %v95_v19, %v89_v18  ;;  %p189_p6 = pnand %p188_p5, %p182_p2 }
  0x2e   :  { %vm83_vm1 = vcmp.lt.f32.partialorder %v82_v21, 0.0004427343  ;;  %v98_v34 = vmul.f32 %v96_v23, %v90_v22 }
  0x31   :  { %v130_v15 = vpop.eup %129 }
  0x32   :  { %v132_v20 = vpop.eup %131  ;;  %v62_v24 = vmul.f32 0.6931472, %v130_v15 }
  0x33   :  { %v64_v26 = vmul.f32 0.6931472, %v132_v20 }
  0x34   :  { %v93_v36 = vmul.f32 %v91_v25, %v62_v24 }
  0x35   :  { %v134_v29 = vpop.eup %133  ;;  %v94_v38 = vmul.f32 %v92_v28, %v64_v26 }
  0x36   :  { %v136_v32 = vpop.eup %135  ;;  %v69_v33 = vmul.f32 0.6931472, %v134_v29 }
  0x37   :  { %v78_v35 = vmul.f32 0.6931472, %v136_v32 }
  0x38   :  { %v75_v37 = vsel %vm74_vm0, %v72_v27, %v69_v33 }
  0x39   :  { %v84_v39 = vsel %vm83_vm1, %v81_v30, %v78_v35  ;;  %v99_v40 = vmul.f32 %v97_v31, %v75_v37 }
  0x3a   :  { %v100_v41 = vmul.f32 %v98_v34, %v84_v39 }
  0x3b   :  { %v101_v42 = vadd.f32 %v99_v40, %v93_v36 }
  0x3c   :  { %v102_v43 = vadd.f32 %v100_v41, %v94_v38 }
  0x3e   :  { %v104_v44 = vadd.f32 %v102_v43, %v101_v42 }
  0x40   :  { %106 = vst [vmem:[#allocation7] sm:$0xff] %v104_v44 }
  0x41   :  { %192 = shalt.err (!%p189_p6)
}
  0x42   :  { %s193_s10 = scalar_lea.hbm %s267_s2, 128 }
  0x43   :  { %p194_p7 = scmp.ne.s32.totalorder %s267_s2, %s193_s10  ;;  %p197_p8 = scmp.lt.u32.totalorder %s193_s10, %s267_s2 }
  0x45   :  { %p199_p9 = pnand %p197_p8, %p194_p7 }
  0x47   :  { %202 = shalt.err (!%p199_p9)
}
  0x48   :  { %116 = dma.vmem_to_hbm [thread:$0]  %s114_s6, 128, %s267_s2, [#allocation4]  }
  0x49   :  { %207 = dma.done.wait [#allocation4], 128  }
  0x4a   :  { %208 = vsyncadd [#allocation4], 4294967168 }
  0x4b   :  { %120 = vsyncpa [#allocation3], 1 }
  0x4c   :  { %121 = vsyncpa [#allocation6], 1 }
  0x4d   :  { %122 = vsyncpa [#allocation4], 1 }

</bundles_post_ra>
